<compile_context>
chip_gen: v7x
topology: tpu7x:2x2x1
jax: 0.10.0
libtpu: 0.0.40
codegen_flags: <defaults>
</compile_context>

<pallas_src>
import jax
import jax.numpy as jnp
from jax import lax
from jax.experimental import pallas as pl
from jax.experimental.pallas import tpu as pltpu


def _cov_loss_kernel(x_ref, out_ref, g_acc, ss_acc):
    """One grid step: a (bt, C, tD) slab. Accumulate Gram + diag energy."""
    dk = pl.program_id(1)
    nd = pl.num_programs(1)
    C = x_ref.shape[1]
    inv_cm1 = 1.0 / (C - 1)

    @pl.when(dk == 0)
    def _init():
        g_acc[...] = jnp.zeros_like(g_acc)
        ss_acc[...] = jnp.zeros_like(ss_acc)

    x = x_ref[...].astype(jnp.float32)                       # (bt, C, tD)

    # Channel-wise standardization (torch.mean / unbiased torch.std).
    # rsqrt runs on the EUP; eps=1e-30 keeps zero-variance (and zero-padded)
    # columns finite, matching the reference's xc/(std+1e-30) = 0 behaviour.
    mean = jnp.mean(x, axis=1, keepdims=True)                # (bt, 1, tD)
    xc = x - mean
    var = jnp.sum(xc * xc, axis=1, keepdims=True) * inv_cm1
    xn = xc * lax.rsqrt(var + 1e-30)

    # Softmax over the channel axis (EUP exp + approx reciprocal).
    m = jnp.max(xn, axis=1, keepdims=True)
    e = jnp.exp(xn - m)
    p = e * pl.reciprocal(jnp.sum(e, axis=1, keepdims=True), approx=True)

    # Center over channels.
    d = p - jnp.mean(p, axis=1, keepdims=True)               # (bt, C, tD)

    # Batched Gram matrix G += d d^T (MXU, contract the lane axis tD) plus the
    # per-column diagonal energy  sum_j (sum_c d[c,j]^2)^2  of this D tile
    # (each column lives entirely in one tile, so this accumulation is exact).
    dmm = d.astype(jnp.bfloat16) if C >= 256 else d          # bf16 MXU for big C
    g_acc[...] += lax.dot_general(
        dmm, dmm, (((2,), (2,)), ((0,), (0,))),
        preferred_element_type=jnp.float32)                  # (bt, C, C)
    s = jnp.sum(d * d, axis=1, keepdims=True)                # (bt, 1, tD)
    ss_acc[...] += jnp.sum(s * s, axis=2, keepdims=True)     # (bt, 1, 1)

    @pl.when(dk == nd - 1)
    def _finalize():
        g = g_acc[...]
        gsq = jnp.sum(jnp.sum(g * g, axis=2, keepdims=True),
                      axis=1, keepdims=True)                 # (bt, 1, 1)
        # (C-1)^2 * sum_{i != j} cov[i, j]^2 per batch element.
        out_ref[...] = gsq - ss_acc[...]


def _choose_tiling(B, C, D):
    """Pick (bt, tD) so one input block is ~2 MiB of f32-equivalent data:
    large enough to sit near the HBM roofline, small enough that the
    double-buffered input + the kernel's f32 temporaries fit scoped VMEM on
    v5e/v6e/v7x (v7x has only 64 MiB physical)."""
    target_elems = (2 * 1024 * 1024) // 4          # 512k elements per block
    row_elems = C * D
    if row_elems > target_elems and D > 128:
        # Tile D (lane axis) in multiples of 128; one batch element per step.
        bt = 1
        tD = max(128, min((target_elems // max(C, 1)) // 128 * 128,
                          ((D + 127) // 128) * 128))
        if D % 128 == 0:
            # Prefer a tile that divides D to avoid a padding copy.
            t = tD
            while t > 128 and D % t != 0:
                t -= 128
            if D % t == 0:
                tD = t
    else:
        tD = D
        bt = max(1, min(B, target_elems // max(row_elems, 1)))
        # Prefer a batch tile that divides B unless it would shrink it >2x.
        b = bt
        while B % b != 0:
            b -= 1
        if b * 2 >= bt:
            bt = b
    return bt, tD


def covariance_loss(x):
    """Pallas forward of CovarianceLossFunc. x: (B, C, H, W). Returns f32 scalar."""
    B, C, H, W = x.shape
    D = H * W
    # Keep the caller's dtype (bf16 inputs halve HBM traffic); upcast in-kernel.
    xr = x.reshape(B, C, D)

    bt, tD = _choose_tiling(B, C, D)
    Bp = ((B + bt - 1) // bt) * bt
    Dp = ((D + tD - 1) // tD) * tD
    if (Bp, Dp) != (B, D):
        # Zero padding is exact: a zero column / zero batch element yields
        # d == 0, contributing nothing to the Gram or diagonal accumulators.
        xr = jnp.pad(xr, ((0, Bp - B), (0, 0), (0, Dp - D)))

    itemsize = jnp.dtype(xr.dtype).itemsize
    in_block = bt * C * tD * itemsize
    f32_block = bt * C * tD * 4
    scratch = bt * C * C * 4 + bt * 8 * 128 * 4
    vmem_limit = int(min(max(2 * in_block + 10 * f32_block + 2 * scratch + (4 << 20),
                             32 << 20),
                         64 << 20))

    grid = (Bp // bt, Dp // tD)
    partials = pl.pallas_call(
        _cov_loss_kernel,
        out_shape=jax.ShapeDtypeStruct((Bp, 1, 1), jnp.float32),
        grid_spec=pltpu.PrefetchScalarGridSpec(
            num_scalar_prefetch=0,
            grid=grid,
            in_specs=[pl.BlockSpec((bt, C, tD), lambda b, k: (b, 0, k))],
            out_specs=pl.BlockSpec((bt, 1, 1), lambda b, k: (b, 0, 0)),
            scratch_shapes=[pltpu.VMEM((bt, C, C), jnp.float32),
                            pltpu.VMEM((bt, 1, 1), jnp.float32)],
        ),
        compiler_params=pltpu.CompilerParams(
            dimension_semantics=("parallel", "arbitrary"),
            vmem_limit_bytes=vmem_limit),
    )(xr)

    # Diagonal is removed by subtraction in f32; clamp tiny negative round-off
    # (near-decorrelated inputs) before the global sum.
    partials = jnp.maximum(partials, 0.0)
    denom = float((C - 1) ** 2) * float(B * C * D * (D - 1))
    return jnp.sum(partials) / denom


def _reference_loss(x):
    """Pure-JAX mirror of the PyTorch forward, for verification."""
    B, C, H, W = x.shape
    D = H * W
    xr = x.reshape(B, C, D).astype(jnp.float32)
    mean = xr.mean(axis=1, keepdims=True)
    std = jnp.sqrt(((xr - mean) ** 2).sum(axis=1, keepdims=True) / (C - 1))
    xn = (xr - mean) / (std + 1e-30)
    p = jax.nn.softmax(xn, axis=1)
    d = p - p.mean(axis=1, keepdims=True)
    cov = jnp.einsum("bnd,bne->bde", d, d) / (C - 1)
    cov = cov * (1.0 - jnp.eye(D)[None])
    return (cov ** 2).sum() / (B * C * D * (D - 1))


if __name__ == "__main__":
    key = jax.random.PRNGKey(0)
    x = jax.random.normal(key, (2, 4, 16, 16), dtype=jnp.float32)

    loss = jax.block_until_ready(covariance_loss(x))
    ref = jax.block_until_ready(_reference_loss(x))

    # Slightly loose rtol: the softmax denominator uses the EUP approx
    # reciprocal (per perf guidance); error is a per-column multiplicative
    # factor well under 1e-3 on the loss.
    assert jnp.allclose(loss, ref, rtol=5e-3, atol=1e-9), (loss, ref)
    print("KERNEL_OK")
</pallas_src>

<mosaic_0001>
module attributes {stable_mosaic.version = 11 : i64} {
  func.func @_cov_loss_kernel(%arg0: i32, %arg1: i32, %arg2: memref<2x4x256xf32, #tpu.memory_space<vmem>>, %arg3: memref<2x1x1xf32, #tpu.memory_space<vmem>>, %arg4: memref<2x4x4xf32, #tpu.memory_space<vmem>>, %arg5: memref<2x1x1xf32, #tpu.memory_space<vmem>>) attributes {dimension_semantics = [#tpu.dimension_semantics<parallel>, #tpu.dimension_semantics<arbitrary>], iteration_bounds = array<i64: 1, 1>, scalar_prefetch = 0 : i64, scratch_operands = 2 : i64, tpu.core_type = #tpu.core_type<tc>, window_params = [{transform_indices = @transform_0, window_bounds = array<i64: 2, 4, 256>}, {transform_indices = @transform_1, window_bounds = array<i64: 2, 1, 1>}]} {
    %c0_i32 = arith.constant 0 : i32
    %0 = arith.cmpi eq, %arg1, %c0_i32 : i32
    %1 = arith.extui %0 : i1 to i32
    %c0_i32_0 = arith.constant 0 : i32
    %2 = arith.cmpi ne, %1, %c0_i32_0 : i32
    scf.if %2 {
      %cst_28 = arith.constant 0.000000e+00 : f32
      %52 = vector.broadcast %cst_28 : f32 to vector<2x4x4xf32>
      %c0_29 = arith.constant 0 : index
      %c0_30 = arith.constant 0 : index
      %c0_31 = arith.constant 0 : index
      %53 = vector.load %arg4[%c0_29, %c0_30, %c0_31] : memref<2x4x4xf32, #tpu.memory_space<vmem>>, vector<2x4x4xf32>
      tpu.vector_store %arg4[%c0_29, %c0_30, %c0_31], %52 {strides = array<i32>} : memref<2x4x4xf32, #tpu.memory_space<vmem>>, vector<2x4x4xf32>,
      %cst_32 = arith.constant 0.000000e+00 : f32
      %54 = vector.broadcast %cst_32 : f32 to vector<2x1x1xf32>
      %c0_33 = arith.constant 0 : index
      %c0_34 = arith.constant 0 : index
      %c0_35 = arith.constant 0 : index
      %55 = vector.load %arg5[%c0_33, %c0_34, %c0_35] : memref<2x1x1xf32, #tpu.memory_space<vmem>>, vector<2x1x1xf32>
      tpu.vector_store %arg5[%c0_33, %c0_34, %c0_35], %54 {strides = array<i32>} : memref<2x1x1xf32, #tpu.memory_space<vmem>>, vector<2x1x1xf32>,
    } else {
    }
    %c0 = arith.constant 0 : index
    %c0_1 = arith.constant 0 : index
    %c0_2 = arith.constant 0 : index
    %3 = vector.load %arg2[%c0, %c0_1, %c0_2] : memref<2x4x256xf32, #tpu.memory_space<vmem>>, vector<2x4x256xf32>
    %cst = arith.constant dense<0.000000e+00> : vector<2x256xf32>
    %4 = vector.multi_reduction <add>, %3, %cst [1] : vector<2x4x256xf32> to vector<2x256xf32>
    %5 = vector.shape_cast %4 : vector<2x256xf32> to vector<2x1x256xf32>
    %cst_3 = arith.constant 4.000000e+00 : f32
    %6 = vector.broadcast %cst_3 : f32 to vector<2x1x256xf32>
    %7 = arith.divf %5, %6 : vector<2x1x256xf32>
    %8 = vector.broadcast %7 : vector<2x1x256xf32> to vector<2x4x256xf32>
    %9 = arith.subf %3, %8 : vector<2x4x256xf32>
    %10 = arith.mulf %9, %9 : vector<2x4x256xf32>
    %cst_4 = arith.constant dense<0.000000e+00> : vector<2x256xf32>
    %11 = vector.multi_reduction <add>, %10, %cst_4 [1] : vector<2x4x256xf32> to vector<2x256xf32>
    %12 = vector.shape_cast %11 : vector<2x256xf32> to vector<2x1x256xf32>
    %cst_5 = arith.constant 0.333333343 : f32
    %13 = vector.broadcast %cst_5 : f32 to vector<2x1x256xf32>
    %14 = arith.mulf %12, %13 : vector<2x1x256xf32>
    %cst_6 = arith.constant 1.000000e-30 : f32
    %15 = vector.broadcast %cst_6 : f32 to vector<2x1x256xf32>
    %16 = arith.addf %14, %15 : vector<2x1x256xf32>
    %17 = math.rsqrt %16 : vector<2x1x256xf32>
    %18 = vector.broadcast %17 : vector<2x1x256xf32> to vector<2x4x256xf32>
    %19 = arith.mulf %9, %18 : vector<2x4x256xf32>
    %cst_7 = arith.constant dense<0xFF800000> : vector<2x256xf32>
    %20 = vector.multi_reduction <maximumf>, %19, %cst_7 [1] : vector<2x4x256xf32> to vector<2x256xf32>
    %21 = vector.shape_cast %20 : vector<2x256xf32> to vector<2x1x256xf32>
    %22 = vector.broadcast %21 : vector<2x1x256xf32> to vector<2x4x256xf32>
    %23 = arith.subf %19, %22 : vector<2x4x256xf32>
    %24 = math.exp %23 : vector<2x4x256xf32>
    %cst_8 = arith.constant dense<0.000000e+00> : vector<2x256xf32>
    %25 = vector.multi_reduction <add>, %24, %cst_8 [1] : vector<2x4x256xf32> to vector<2x256xf32>
    %26 = vector.shape_cast %25 : vector<2x256xf32> to vector<2x1x256xf32>
    %27 = tpu.reciprocal %26 {approx = true} : vector<2x1x256xf32> -> vector<2x1x256xf32>
    %28 = vector.broadcast %27 : vector<2x1x256xf32> to vector<2x4x256xf32>
    %29 = arith.mulf %24, %28 : vector<2x4x256xf32>
    %cst_9 = arith.constant dense<0.000000e+00> : vector<2x256xf32>
    %30 = vector.multi_reduction <add>, %29, %cst_9 [1] : vector<2x4x256xf32> to vector<2x256xf32>
    %31 = vector.shape_cast %30 : vector<2x256xf32> to vector<2x1x256xf32>
    %cst_10 = arith.constant 4.000000e+00 : f32
    %32 = vector.broadcast %cst_10 : f32 to vector<2x1x256xf32>
    %33 = arith.divf %31, %32 : vector<2x1x256xf32>
    %34 = vector.broadcast %33 : vector<2x1x256xf32> to vector<2x4x256xf32>
    %35 = arith.subf %29, %34 : vector<2x4x256xf32>
    %c0_11 = arith.constant 0 : index
    %c0_12 = arith.constant 0 : index
    %c0_13 = arith.constant 0 : index
    %36 = vector.load %arg4[%c0_11, %c0_12, %c0_13] : memref<2x4x4xf32, #tpu.memory_space<vmem>>, vector<2x4x4xf32>
    %cst_14 = arith.constant dense<0.000000e+00> : vector<2x4x4xf32>
    %37 = tpu.matmul %35, %35, %cst_14 {dimension_numbers = #tpu.dot_dimension_numbers<[2], [2], [1], [1], [0, 0, 0, 1, 1, 1], [0], [0]>} : vector<2x4x256xf32>, vector<2x4x256xf32>, vector<2x4x4xf32> -> vector<2x4x4xf32>
    %38 = arith.addf %36, %37 : vector<2x4x4xf32>
    %c0_15 = arith.constant 0 : index
    %c0_16 = arith.constant 0 : index
    %c0_17 = arith.constant 0 : index
    %39 = vector.load %arg4[%c0_15, %c0_16, %c0_17] : memref<2x4x4xf32, #tpu.memory_space<vmem>>, vector<2x4x4xf32>
    tpu.vector_store %arg4[%c0_15, %c0_16, %c0_17], %38 {strides = array<i32>} : memref<2x4x4xf32, #tpu.memory_space<vmem>>, vector<2x4x4xf32>,
    %40 = arith.mulf %35, %35 : vector<2x4x256xf32>
    %cst_18 = arith.constant dense<0.000000e+00> : vector<2x256xf32>
    %41 = vector.multi_reduction <add>, %40, %cst_18 [1] : vector<2x4x256xf32> to vector<2x256xf32>
    %42 = vector.shape_cast %41 : vector<2x256xf32> to vector<2x1x256xf32>
    %c0_19 = arith.constant 0 : index
    %c0_20 = arith.constant 0 : index
    %c0_21 = arith.constant 0 : index
    %43 = vector.load %arg5[%c0_19, %c0_20, %c0_21] : memref<2x1x1xf32, #tpu.memory_space<vmem>>, vector<2x1x1xf32>
    %44 = arith.mulf %42, %42 : vector<2x1x256xf32>
    %cst_22 = arith.constant dense<0.000000e+00> : vector<2x1xf32>
    %45 = vector.multi_reduction <add>, %44, %cst_22 [2] : vector<2x1x256xf32> to vector<2x1xf32>
    %46 = vector.shape_cast %45 : vector<2x1xf32> to vector<2x1x1xf32>
    %47 = arith.addf %43, %46 : vector<2x1x1xf32>
    %c0_23 = arith.constant 0 : index
    %c0_24 = arith.constant 0 : index
    %c0_25 = arith.constant 0 : index
    %48 = vector.load %arg5[%c0_23, %c0_24, %c0_25] : memref<2x1x1xf32, #tpu.memory_space<vmem>>, vector<2x1x1xf32>
    tpu.vector_store %arg5[%c0_23, %c0_24, %c0_25], %47 {strides = array<i32>} : memref<2x1x1xf32, #tpu.memory_space<vmem>>, vector<2x1x1xf32>,
    %c0_i32_26 = arith.constant 0 : i32
    %49 = arith.cmpi eq, %arg1, %c0_i32_26 : i32
    %50 = arith.extui %49 : i1 to i32
    %c0_i32_27 = arith.constant 0 : i32
    %51 = arith.cmpi ne, %50, %c0_i32_27 : i32
    scf.if %51 {
      %c0_28 = arith.constant 0 : index
      %c0_29 = arith.constant 0 : index
      %c0_30 = arith.constant 0 : index
      %52 = vector.load %arg4[%c0_28, %c0_29, %c0_30] : memref<2x4x4xf32, #tpu.memory_space<vmem>>, vector<2x4x4xf32>
      %53 = arith.mulf %52, %52 : vector<2x4x4xf32>
      %cst_31 = arith.constant dense<0.000000e+00> : vector<2x4xf32>
      %54 = vector.multi_reduction <add>, %53, %cst_31 [2] : vector<2x4x4xf32> to vector<2x4xf32>
      %55 = vector.shape_cast %54 : vector<2x4xf32> to vector<2x4x1xf32>
      %cst_32 = arith.constant dense<0.000000e+00> : vector<2x1xf32>
      %56 = vector.multi_reduction <add>, %55, %cst_32 [1] : vector<2x4x1xf32> to vector<2x1xf32>
      %57 = vector.shape_cast %56 : vector<2x1xf32> to vector<2x1x1xf32>
      %c0_33 = arith.constant 0 : index
      %c0_34 = arith.constant 0 : index
      %c0_35 = arith.constant 0 : index
      %58 = vector.load %arg5[%c0_33, %c0_34, %c0_35] : memref<2x1x1xf32, #tpu.memory_space<vmem>>, vector<2x1x1xf32>
      %59 = arith.subf %57, %58 : vector<2x1x1xf32>
      %c0_36 = arith.constant 0 : index
      %c0_37 = arith.constant 0 : index
      %c0_38 = arith.constant 0 : index
      %60 = vector.load %arg3[%c0_36, %c0_37, %c0_38] : memref<2x1x1xf32, #tpu.memory_space<vmem>>, vector<2x1x1xf32>
      tpu.vector_store %arg3[%c0_36, %c0_37, %c0_38], %59 {strides = array<i32>} : memref<2x1x1xf32, #tpu.memory_space<vmem>>, vector<2x1x1xf32>,
    } else {
    }
    return
  }
  func.func @transform_0(%arg0: i32, %arg1: i32) -> (i32, i32, i32) {
    %c0_i32 = arith.constant 0 : i32
    %c0_i32_0 = arith.constant 0 : i32
    return %arg0, %c0_i32, %arg1 : i32, i32, i32
  }
  func.func @transform_1(%arg0: i32, %arg1: i32) -> (i32, i32, i32) {
    %c0_i32 = arith.constant 0 : i32
    %c0_i32_0 = arith.constant 0 : i32
    %c0_i32_1 = arith.constant 0 : i32
    return %arg0, %c0_i32, %c0_i32_0 : i32, i32, i32
  }
}

</mosaic_0001>

<bundles_post_ra>
// kernel: tpu_custom_call.1
= control target key start
LH: loop header
LB: loop body
LE: loop exit
PB: predicated region body
PF: predicated region fallthrough
CT: control target
= control target key end

     0   :  { %6 = vsyncpa [#allocation5], 0  ;;  %s580_s6 = smov [#allocation4]   ;;  %s654_s0 = inlined_call_operand.hbm [shape: f32[2,4,256], index: 0, kind: input, shape index: {}]   ;;  %s655_s1 = inlined_call_operand.vmem [shape: f32[2,1,1], index: 1, kind: output, shape index: {}]  }
   0x1   :  { %s12_s7 = sshll.u32 %s580_s6, 4  ;;  %s556_s10 = scalar_lea.hbm %s654_s0, 256  ;;  %s13_s7 = int_to_ptr.vmem [resolvable:$true] %s12_s7 }
   0x2   :  { %p557_p0 = scmp.ne.s32.totalorder %s654_s0, %s556_s10  ;;  %p560_p1 = scmp.lt.u32.totalorder %s556_s10, %s654_s0 }
   0x4   :  { %p562_p2 = pnand %p560_p1, %p557_p0 }
   0x6   :  { %565 = shalt.err (!%p562_p2)
}
   0x7   :  { %s566_s15 = scalar_lea.vmem %s13_s7, 256  ;;  %p571_p4 = scmp.lt.s32.totalorder %s13_s7, %s13_s7 }
   0x8   :  { %p567_p3 = scmp.ne.s32.totalorder %s13_s7, %s566_s15  ;;  %p572_p5 = scmp.lt.s32.totalorder %s566_s15, %s566_s15 }
   0xa   :  { %p573_p6 = por %p572_p5, %p571_p4 }
   0xc   :  { %p574_p7 = pnand %p573_p6, %p567_p3 }
   0xe   :  { %577 = shalt.err (!%p574_p7)
}
   0xf   :  { %s581_s16 = smov 128   ;;  %s582_s17 = smov 8  }
  0x10   :  { %18 = dma.hbm_to_vmem [thread:$0]  %s654_s0, 256, %s13_s7, [#allocation5], %s581_s16, %s581_s16, %s582_s17  }
  0x11   :  { %578 = dma.done.wait [#allocation5], 256  }
  0x12   :  { %579 = vsyncadd [#allocation5], 4294967040  ;;  %vm40_vm0 = vcmask 1043456   ;;  %v32_v0 = vld [vmem:[#allocation4] sm:$0xff]  ;;  %v33_v1 = vld [vmem:[#allocation4 + $0x8] sm:$0xff]  ;;  %vm26_vm1 = vcmask 27648  }
  0x13   :  { %v36_v2 = vcombine.high %v32_v0, %v32_v0  ;;  %v41_v3 = vsel %vm40_vm0, %v32_v0, 0.0  ;;  %v37_v4 = vcombine.high %v33_v1, %v33_v1  ;;  %v55_v5 = vsel %vm40_vm0, %v33_v1, 0.0 }
  0x14   :  { %v42_v6 = vrot.slane %v41_v3, 4  ;;  %v56_v7 = vrot.slane %v55_v5, 4  ;;  %v583_v40 = vmov 0.0   ;;  %vm29_vm2 = vcmask 0  }
  0x15   :  { %v48_v8 = vsel %vm40_vm0, %v36_v2, 0.0  ;;  %v62_v9 = vsel %vm40_vm0, %v37_v4, 0.0  ;;  %27 = vst.msk [vmem:[#allocation2] sm:$0xf] %vm26_vm1, %v583_v40  ;;  %28 = vst.msk [vmem:[#allocation2 + $0x4] sm:$0xf] %vm26_vm1, %v583_v40 }
  0x16   :  { %v43_v10 = vadd.f32 %v42_v6, %v41_v3  ;;  %v49_v11 = vrot.slane %v48_v8, 4  ;;  %v57_v12 = vadd.f32 %v56_v7, %v55_v5  ;;  %v63_v13 = vrot.slane %v62_v9, 4  ;;  %30 = vst.msk [vmem:[#allocation3] sm:$0x1] %vm29_vm2, %v583_v40  ;;  %31 = vst.msk [vmem:[#allocation3 + $0x1] sm:$0x1] %vm29_vm2, %v583_v40 }
  0x18   :  { %v44_v14 = vrot.slane %v43_v10, 2  ;;  %v50_v15 = vadd.f32 %v49_v11, %v48_v8  ;;  %v58_v16 = vrot.slane %v57_v12, 2  ;;  %v64_v17 = vadd.f32 %v63_v13, %v62_v9 }
  0x1a   :  { %v45_v18 = vadd.f32 %v44_v14, %v43_v10  ;;  %v51_v19 = vrot.slane %v50_v15, 2  ;;  %v59_v20 = vadd.f32 %v58_v16, %v57_v12  ;;  %v65_v21 = vrot.slane %v64_v17, 2 }
  0x1c   :  { %v46_v22 = vrot.slane %v45_v18, 1  ;;  %v52_v23 = vadd.f32 %v51_v19, %v50_v15  ;;  %v60_v24 = vrot.slane %v59_v20, 1  ;;  %v66_v25 = vadd.f32 %v65_v21, %v64_v17 }
  0x1e   :  { %v47_v26 = vadd.f32 %v46_v22, %v45_v18  ;;  %v53_v27 = vrot.slane %v52_v23, 1  ;;  %v61_v28 = vadd.f32 %v60_v24, %v59_v20  ;;  %v67_v29 = vrot.slane %v66_v25, 1 }
  0x20   :  { %v54_v30 = vadd.f32 %v53_v27, %v52_v23  ;;  %v70_v31 = vmul.f32 0.25, %v47_v26  ;;  %v68_v32 = vadd.f32 %v67_v29, %v66_v25  ;;  %v72_v33 = vmul.f32 0.25, %v61_v28 }
  0x22   :  { %v71_v34 = vmul.f32 0.25, %v54_v30  ;;  %v73_v35 = vmul.f32 0.25, %v68_v32 }
  0x24   :  { %v78_v36 = vcombine.low %v70_v31, %v71_v34  ;;  %v79_v37 = vcombine.low %v72_v33, %v73_v35 }
  0x26   :  { %v82_v38 = vsub.f32 %v32_v0, %v78_v36  ;;  %v83_v39 = vsub.f32 %v33_v1, %v79_v37 }
  0x28   :  { %v84_v41 = vmul.f32 %v82_v38, %v82_v38  ;;  %v85_v42 = vmul.f32 %v83_v39, %v83_v39 }
  0x2a   :  { %v88_v43 = vcombine.high %v84_v41, %v84_v41  ;;  %v92_v44 = vsel %vm40_vm0, %v84_v41, 0.0  ;;  %v89_v45 = vcombine.high %v85_v42, %v85_v42  ;;  %v106_v46 = vsel %vm40_vm0, %v85_v42, 0.0 }
  0x2b   :  { %v93_v47 = vrot.slane %v92_v44, 4  ;;  %v107_v48 = vrot.slane %v106_v46, 4 }
  0x2c   :  { %v99_v49 = vsel %vm40_vm0, %v88_v43, 0.0  ;;  %v113_v50 = vsel %vm40_vm0, %v89_v45, 0.0 }
  0x2d   :  { %v94_v51 = vadd.f32 %v93_v47, %v92_v44  ;;  %v100_v52 = vrot.slane %v99_v49, 4  ;;  %v108_v53 = vadd.f32 %v107_v48, %v106_v46  ;;  %v114_v54 = vrot.slane %v113_v50, 4 }
  0x2f   :  { %v95_v55 = vrot.slane %v94_v51, 2  ;;  %v101_v56 = vadd.f32 %v100_v52, %v99_v49  ;;  %v109_v57 = vrot.slane %v108_v53, 2  ;;  %v115_v58 = vadd.f32 %v114_v54, %v113_v50 }
  0x31   :  { %v96_v59 = vadd.f32 %v95_v55, %v94_v51  ;;  %v102_v60 = vrot.slane %v101_v56, 2  ;;  %v110_v61 = vadd.f32 %v109_v57, %v108_v53  ;;  %v116_v62 = vrot.slane %v115_v58, 2 }
  0x33   :  { %v97_v63 = vrot.slane %v96_v59, 1  ;;  %v103_v0 = vadd.f32 %v102_v60, %v101_v56  ;;  %v111_v1 = vrot.slane %v110_v61, 1  ;;  %v117_v2 = vadd.f32 %v116_v62, %v115_v58 }
  0x35   :  { %v98_v3 = vadd.f32 %v97_v63, %v96_v59  ;;  %v104_v4 = vrot.slane %v103_v0, 1  ;;  %v112_v5 = vadd.f32 %v111_v1, %v110_v61  ;;  %v118_v6 = vrot.slane %v117_v2, 1 }
  0x37   :  { %v105_v7 = vadd.f32 %v104_v4, %v103_v0  ;;  %v120_v8 = vmul.f32 0.33333334, %v98_v3  ;;  %v119_v9 = vadd.f32 %v118_v6, %v117_v2  ;;  %v122_v10 = vmul.f32 0.33333334, %v112_v5 }
  0x39   :  { %v121_v11 = vmul.f32 0.33333334, %v105_v7  ;;  %v124_v12 = vadd.f32 1e-30, %v120_v8  ;;  %v123_v13 = vmul.f32 0.33333334, %v119_v9 }
  0x3a   :  { %v126_v14 = vadd.f32 1e-30, %v122_v10 }
  0x3b   :  { %v125_v15 = vadd.f32 1e-30, %v121_v11  ;;  %536 = vrsqrt.f32 %v124_v12  ;;  %v127_v16 = vadd.f32 1e-30, %v123_v13 }
  0x3c   :  { %538 = vrsqrt.f32 %v126_v14 }
  0x3d   :  { %540 = vrsqrt.f32 %v125_v15 }
  0x3e   :  { %542 = vrsqrt.f32 %v127_v16 }
  0x45   :  { %v537_v17 = vpop.eup %536 }
  0x46   :  { %v539_v18 = vpop.eup %538 }
  0x47   :  { %v541_v19 = vpop.eup %540 }
  0x48   :  { %v543_v20 = vpop.eup %542  ;;  %v136_v21 = vcombine.low %v537_v17, %v541_v19 }
  0x49   :  { %v137_v22 = vcombine.low %v539_v18, %v543_v20 }
  0x4a   :  { %v140_v23 = vmul.f32 %v136_v21, %v82_v38 }
  0x4b   :  { %v141_v24 = vmul.f32 %v137_v22, %v83_v39 }
  0x4c   :  { %v144_v25 = vcombine.high %v140_v23, %v140_v23  ;;  %v148_v26 = vsel %vm40_vm0, %v140_v23, -inf }
  0x4d   :  { %v149_v27 = vrot.slane %v148_v26, 4  ;;  %v145_v28 = vcombine.high %v141_v24, %v141_v24  ;;  %v162_v29 = vsel %vm40_vm0, %v141_v24, -inf }
  0x4e   :  { %v155_v30 = vsel %vm40_vm0, %v144_v25, -inf  ;;  %v163_v31 = vrot.slane %v162_v29, 4 }
  0x4f   :  { %v150_v32 = vmax.f32 %v148_v26, %v149_v27  ;;  %v156_v33 = vrot.slane %v155_v30, 4  ;;  %v169_v34 = vsel %vm40_vm0, %v145_v28, -inf }
  0x50   :  { %v164_v35 = vmax.f32 %v162_v29, %v163_v31  ;;  %v170_v36 = vrot.slane %v169_v34, 4 }
  0x51   :  { %v151_v37 = vrot.slane %v150_v32, 2  ;;  %v157_v41 = vmax.f32 %v155_v30, %v156_v33 }
  0x52   :  { %v165_v38 = vrot.slane %v164_v35, 2  ;;  %v171_v39 = vmax.f32 %v169_v34, %v170_v36 }
  0x53   :  { %v152_v42 = vmax.f32 %v150_v32, %v151_v37  ;;  %v158_v43 = vrot.slane %v157_v41, 2 }
  0x54   :  { %v166_v44 = vmax.f32 %v164_v35, %v165_v38  ;;  %v172_v45 = vrot.slane %v171_v39, 2 }
  0x55   :  { %v153_v46 = vrot.slane %v152_v42, 1  ;;  %v159_v47 = vmax.f32 %v157_v41, %v158_v43 }
  0x56   :  { %v167_v48 = vrot.slane %v166_v44, 1  ;;  %v173_v49 = vmax.f32 %v171_v39, %v172_v45 }
  0x57   :  { %v154_v50 = vmax.f32 %v152_v42, %v153_v46  ;;  %v160_v51 = vrot.slane %v159_v47, 1 }
  0x58   :  { %v168_v52 = vmax.f32 %v166_v44, %v167_v48  ;;  %v174_v53 = vrot.slane %v173_v49, 1 }
  0x59   :  { %v161_v54 = vmax.f32 %v159_v47, %v160_v51 }
  0x5a   :  { %v175_v55 = vmax.f32 %v173_v49, %v174_v53 }
  0x5b   :  { %v180_v56 = vcombine.low %v154_v50, %v161_v54 }
  0x5c   :  { %v181_v57 = vcombine.low %v168_v52, %v175_v55 }
  0x5d   :  { %v184_v58 = vsub.f32 %v140_v23, %v180_v56 }
  0x5e   :  { %v185_v59 = vsub.f32 %v141_v24, %v181_v57 }
  0x5f   :  { %v186_v60 = vmul.f32 1.442695, %v184_v58 }
  0x60   :  { %v188_v61 = vmul.f32 1.442695, %v185_v59 }
  0x61   :  { %544 = vpow2.f32 %v186_v60 }
  0x62   :  { %546 = vpow2.f32 %v188_v61 }
  0x6b   :  { %v545_v62 = vpop.eup %544 }
  0x6c   :  { %v547_v63 = vpop.eup %546  ;;  %v192_v0 = vcombine.high %v545_v62, %v545_v62  ;;  %v196_v1 = vsel %vm40_vm0, %v545_v62, 0.0 }
  0x6d   :  { %v197_v2 = vrot.slane %v196_v1, 4  ;;  %v193_v3 = vcombine.high %v547_v63, %v547_v63  ;;  %v210_v4 = vsel %vm40_vm0, %v547_v63, 0.0 }
  0x6e   :  { %v203_v5 = vsel %vm40_vm0, %v192_v0, 0.0  ;;  %v211_v6 = vrot.slane %v210_v4, 4 }
  0x6f   :  { %v198_v7 = vadd.f32 %v197_v2, %v196_v1  ;;  %v204_v8 = vrot.slane %v203_v5, 4  ;;  %v217_v9 = vsel %vm40_vm0, %v193_v3, 0.0 }
  0x70   :  { %v212_v10 = vadd.f32 %v211_v6, %v210_v4  ;;  %v218_v11 = vrot.slane %v217_v9, 4 }
  0x71   :  { %v199_v12 = vrot.slane %v198_v7, 2  ;;  %v205_v13 = vadd.f32 %v204_v8, %v203_v5 }
  0x72   :  { %v213_v14 = vrot.slane %v212_v10, 2  ;;  %v219_v15 = vadd.f32 %v218_v11, %v217_v9 }
  0x73   :  { %v200_v16 = vadd.f32 %v199_v12, %v198_v7  ;;  %v206_v17 = vrot.slane %v205_v13, 2 }
  0x74   :  { %v214_v18 = vadd.f32 %v213_v14, %v212_v10  ;;  %v220_v19 = vrot.slane %v219_v15, 2 }
  0x75   :  { %v201_v20 = vrot.slane %v200_v16, 1  ;;  %v207_v21 = vadd.f32 %v206_v17, %v205_v13 }
  0x76   :  { %v215_v22 = vrot.slane %v214_v18, 1  ;;  %v221_v23 = vadd.f32 %v220_v19, %v219_v15 }
  0x77   :  { %v202_v24 = vadd.f32 %v201_v20, %v200_v16  ;;  %v208_v25 = vrot.slane %v207_v21, 1 }
  0x78   :  { %v216_v26 = vadd.f32 %v215_v22, %v214_v18  ;;  %v222_v27 = vrot.slane %v221_v23, 1 }
  0x79   :  { %v209_v28 = vadd.f32 %v208_v25, %v207_v21  ;;  %548 = vrcp.f32 %v202_v24 }
  0x7a   :  { %v223_v29 = vadd.f32 %v222_v27, %v221_v23  ;;  %550 = vrcp.f32 %v216_v26 }
  0x7b   :  { %552 = vrcp.f32 %v209_v28 }
  0x7c   :  { %554 = vrcp.f32 %v223_v29 }
  0x83   :  { %v549_v30 = vpop.eup %548 }
  0x84   :  { %v551_v31 = vpop.eup %550 }
  0x85   :  { %v553_v32 = vpop.eup %552 }
  0x86   :  { %v555_v33 = vpop.eup %554  ;;  %v232_v34 = vcombine.low %v549_v30, %v553_v32 }
  0x87   :  { %v233_v35 = vcombine.low %v551_v31, %v555_v33 }
  0x88   :  { %v236_v36 = vmul.f32 %v545_v62, %v232_v34 }
  0x89   :  { %v237_v37 = vmul.f32 %v547_v63, %v233_v35 }
  0x8a   :  { %v240_v41 = vcombine.high %v236_v36, %v236_v36  ;;  %v244_v38 = vsel %vm40_vm0, %v236_v36, 0.0 }
  0x8b   :  { %v245_v39 = vrot.slane %v244_v38, 4  ;;  %v241_v42 = vcombine.high %v237_v37, %v237_v37  ;;  %v258_v43 = vsel %vm40_vm0, %v237_v37, 0.0 }
  0x8c   :  { %v251_v44 = vsel %vm40_vm0, %v240_v41, 0.0  ;;  %v259_v45 = vrot.slane %v258_v43, 4 }
  0x8d   :  { %v246_v46 = vadd.f32 %v245_v39, %v244_v38  ;;  %v252_v47 = vrot.slane %v251_v44, 4  ;;  %v265_v48 = vsel %vm40_vm0, %v241_v42, 0.0 }
  0x8e   :  { %v260_v49 = vadd.f32 %v259_v45, %v258_v43  ;;  %v266_v50 = vrot.slane %v265_v48, 4 }
  0x8f   :  { %v247_v51 = vrot.slane %v246_v46, 2  ;;  %v253_v52 = vadd.f32 %v252_v47, %v251_v44 }
  0x90   :  { %v261_v53 = vrot.slane %v260_v49, 2  ;;  %v267_v54 = vadd.f32 %v266_v50, %v265_v48 }
  0x91   :  { %v248_v55 = vadd.f32 %v247_v51, %v246_v46  ;;  %v254_v56 = vrot.slane %v253_v52, 2 }
  0x92   :  { %v262_v57 = vadd.f32 %v261_v53, %v260_v49  ;;  %v268_v58 = vrot.slane %v267_v54, 2 }
  0x93   :  { %v249_v59 = vrot.slane %v248_v55, 1  ;;  %v255_v60 = vadd.f32 %v254_v56, %v253_v52 }
  0x94   :  { %v263_v61 = vrot.slane %v262_v57, 1  ;;  %v269_v62 = vadd.f32 %v268_v58, %v267_v54  ;;  %v286_v54 = vld [vmem:[#allocation2] sm:$0xf] }
  0x95   :  { %v250_v63 = vadd.f32 %v249_v59, %v248_v55  ;;  %v256_v0 = vrot.slane %v255_v60, 1  ;;  %v287_v55 = vld [vmem:[#allocation2 + $0x4] sm:$0xf] }
  0x96   :  { %v264_v1 = vadd.f32 %v263_v61, %v262_v57  ;;  %v270_v2 = vrot.slane %v269_v62, 1 }
  0x97   :  { %v257_v3 = vadd.f32 %v256_v0, %v255_v60  ;;  %v272_v4 = vmul.f32 0.25, %v250_v63 }
  0x98   :  { %v271_v5 = vadd.f32 %v270_v2, %v269_v62  ;;  %v274_v6 = vmul.f32 0.25, %v264_v1 }
  0x99   :  { %v273_v7 = vmul.f32 0.25, %v257_v3 }
  0x9a   :  { %v275_v8 = vmul.f32 0.25, %v271_v5  ;;  %v475_v5 = vld [vmem:[#allocation3] sm:$0x1] }
  0x9b   :  { %v280_v9 = vcombine.low %v272_v4, %v273_v7 }
  0x9c   :  { %v281_v10 = vcombine.low %v274_v6, %v275_v8  ;;  %v476_v8 = vld [vmem:[#allocation3 + $0x1] sm:$0x1] }
  0x9d   :  { %v284_v11 = vsub.f32 %v236_v36, %v280_v9 }
  0x9e   :  { %v285_v12 = vsub.f32 %v237_v37, %v281_v10 }
  0x9f   :  { %v289_v13 = vcombine.high %v284_v11, %v284_v11  ;;  %v439_v15 = vmul.f32 %v284_v11, %v284_v11 }
  0xa0   :  { %v362_v14 = vcombine.high %v285_v12, %v285_v12  ;;  %v440_v19 = vmul.f32 %v285_v12, %v285_v12 }
  0xa1   :  { %291 = vmatprep.subr.mxu0 %v289_v13  ;;  %355 = vmatprep.mubr.f32.mxu0 %v289_v13  ;;  %v443_v16 = vcombine.high %v439_v15, %v439_v15  ;;  %v447_v17 = vsel %vm40_vm0, %v439_v15, 0.0 }
  0xa2   :  { %292 = vmatpush1.xpose.msra.mxu0 %v284_v11  ;;  %364 = vmatprep.subr.mxu1 %v362_v14  ;;  %v448_v20 = vrot.slane %v447_v17, 4  ;;  %v444_v22 = vcombine.high %v440_v19, %v440_v19  ;;  %v461_v25 = vsel %vm40_vm0, %v440_v19, 0.0 }
  0xa3   :  { %365 = vmatpush1.xpose.msra.mxu1 %v285_v12  ;;  %428 = vmatprep.mubr.f32.mxu1 %v362_v14  ;;  %v454_v18 = vsel %vm40_vm0, %v443_v16, 0.0  ;;  %v462_v29 = vrot.slane %v461_v25, 4 }
  0xa4   :  { %v455_v21 = vrot.slane %v454_v18, 4  ;;  %v449_v23 = vadd.f32 %v448_v20, %v447_v17  ;;  %v468_v26 = vsel %vm40_vm0, %v444_v22, 0.0 }
  0xa5   :  { %356 = vmatmul.mubr.f32.vlgmr.msra.gmra.mrb[0].mxu0 %v284_v11  ;;  %v469_v30 = vrot.slane %v468_v26, 4  ;;  %v463_v33 = vadd.f32 %v462_v29, %v461_v25 }
  0xa6   :  { %429 = vmatmul.mubr.f32.vlgmr.msra.gmra.mrb[0].mxu1 %v285_v12  ;;  %v456_v24 = vadd.f32 %v455_v21, %v454_v18  ;;  %v450_v27 = vrot.slane %v449_v23, 2 }
  0xa7   :  { %v470_v34 = vadd.f32 %v469_v30, %v468_v26  ;;  %v464_v37 = vrot.slane %v463_v33, 2 }
  0xa8   :  { %v457_v28 = vrot.slane %v456_v24, 2  ;;  %v451_v31 = vadd.f32 %v450_v27, %v449_v23 }
  0xa9   :  { %v471_v41 = vrot.slane %v470_v34, 2  ;;  %v465_v42 = vadd.f32 %v464_v37, %v463_v33 }
  0xaa   :  { %v458_v32 = vadd.f32 %v457_v28, %v456_v24  ;;  %v452_v35 = vrot.slane %v451_v31, 1 }
  0xab   :  { %v472_v43 = vadd.f32 %v471_v41, %v470_v34  ;;  %v466_v46 = vrot.slane %v465_v42, 1 }
  0xac   :  { %v459_v36 = vrot.slane %v458_v32, 1  ;;  %v453_v38 = vadd.f32 %v452_v35, %v451_v31 }
  0xad   :  { %v473_v47 = vrot.slane %v472_v43, 1  ;;  %v467_v49 = vadd.f32 %v466_v46, %v465_v42 }
  0xae   :  { %v460_v39 = vadd.f32 %v459_v36, %v458_v32  ;;  %v477_v44 = vmul.f32 %v453_v38, %v453_v38 }
  0xaf   :  { %v474_v50 = vadd.f32 %v473_v47, %v472_v43  ;;  %v479_v51 = vmul.f32 %v467_v49, %v467_v49 }
  0xb0   :  { %v478_v45 = vmul.f32 %v460_v39, %v460_v39 }
  0xb1   :  { %v480_v52 = vmul.f32 %v474_v50, %v474_v50 }
  0xb2   :  { %v481_v48 = vadd.f32 %v478_v45, %v477_v44 }
  0xb3   :  { %v484_v53 = vadd.f32 %v480_v52, %v479_v51 }
  0xb4   :  { %482 = vadd.xlane.f32.xlu1 %v481_v48 }
  0xb8   :  { %485 = vadd.xlane.f32.xlu1 %v484_v53 }
 0x141   :  { %v483_v4 = vpop.xlane.xlu1 %482 }
 0x142   :  { %v487_v6 = vadd.f32 %v483_v4, %v475_v5 }
 0x144   :  { %490 = vst.msk [vmem:[#allocation3] sm:$0x1] %vm29_vm2, %v487_v6 }
 0x145   :  { %v486_v7 = vpop.xlane.xlu1 %485 }
 0x146   :  { %v488_v9 = vadd.f32 %v486_v7, %v476_v8 }
 0x148   :  { %491 = vst.msk [vmem:[#allocation3 + $0x1] sm:$0x1] %vm29_vm2, %v488_v9 }
 0x14b   :  { %v519_v21 = vld [vmem:[#allocation3] sm:$0x1] }
 0x14f   :  { %v520_v26 = vld [vmem:[#allocation3 + $0x1] sm:$0x1] }
 0x178   :  { %v357_v56 = vpop.f32.mrb[0].mxu0 }
 0x179   :  { %v434_v57 = vadd.f32 %v357_v56, %v286_v54  ;;  %v359_v58 = vpop.f32.mrb[1].mxu0  ;;  %v430_v59 = vpop.f32.mrb[0].mxu1 }
 0x17a   :  { %v435_v60 = vadd.f32 %v430_v59, %v287_v55  ;;  %v432_v61 = vpop.f32.mrb[1].mxu1 }
 0x17b   :  { %437 = vst.msk [vmem:[#allocation2] sm:$0xf] %vm26_vm1, %v434_v57 }
 0x17c   :  { %438 = vst.msk [vmem:[#allocation2 + $0x4] sm:$0xf] %vm26_vm1, %v435_v60 }
 0x182   :  { %v495_v62 = vld [vmem:[#allocation2] sm:$0xf] }
 0x183   :  { %v497_v63 = vmul.f32 %v495_v62, %v495_v62  ;;  %v496_v0 = vld [vmem:[#allocation2 + $0x4] sm:$0xf] }
 0x184   :  { %v498_v1 = vmul.f32 %v496_v0, %v496_v0 }
 0x185   :  { %v499_v2 = vsel %vm26_vm1, %v497_v63, 0.0 }
 0x186   :  { %500 = vadd.xlane.f32.xlu0 %v499_v2  ;;  %v502_v3 = vsel %vm26_vm1, %v498_v1, 0.0 }
 0x18a   :  { %503 = vadd.xlane.f32.xlu0 %v502_v3 }
 0x213   :  { %v501_v10 = vpop.xlane.xlu0 %500 }
 0x214   :  { %v505_v11 = vsel %vm40_vm0, %v501_v10, 0.0 }
 0x215   :  { %v506_v12 = vrot.slane %v505_v11, 4 }
 0x217   :  { %v507_v13 = vadd.f32 %v506_v12, %v505_v11  ;;  %v504_v14 = vpop.xlane.xlu0 %503 }
 0x218   :  { %v512_v15 = vsel %vm40_vm0, %v504_v14, 0.0 }
 0x219   :  { %v508_v16 = vrot.slane %v507_v13, 2  ;;  %v513_v40 = vrot.slane %v512_v15, 4 }
 0x21b   :  { %v509_v17 = vadd.f32 %v508_v16, %v507_v13  ;;  %v514_v18 = vadd.f32 %v513_v40, %v512_v15 }
 0x21d   :  { %v510_v19 = vrot.slane %v509_v17, 1  ;;  %v515_v20 = vrot.slane %v514_v18, 2 }
 0x21f   :  { %v511_v22 = vadd.f32 %v510_v19, %v509_v17  ;;  %v516_v23 = vadd.f32 %v515_v20, %v514_v18 }
 0x221   :  { %v521_v24 = vsub.f32 %v511_v22, %v519_v21  ;;  %v517_v25 = vrot.slane %v516_v23, 1 }
 0x223   :  { %523 = vst.msk [vmem:[%s655_s1] sm:$0x1] %vm29_vm2, %v521_v24  ;;  %v518_v27 = vadd.f32 %v517_v25, %v516_v23 }
 0x225   :  { %v522_v28 = vsub.f32 %v518_v27, %v520_v26 }
 0x227   :  { %524 = vst.msk [vmem:[%s655_s1 + $0x1] sm:$0x1] %vm29_vm2, %v522_v28 }
 0x228   :  { %529 = vsyncpa [#allocation5], 1 }

</bundles_post_ra>
